<compile_context>
chip_gen: v7x
topology: tpu7x:2x2x1
jax: 0.10.0
libtpu: 0.0.40
codegen_flags: <defaults>
</compile_context>

<pallas_src>
import functools

import jax
import jax.numpy as jnp
from jax.experimental import pallas as pl
from jax.experimental.pallas import tpu as pltpu

EPS = 1e-5  # nn.BatchNorm1d default


# ----------------------------------------------------------------------------- kernel
def _make_fused_mlp_kernel(num_hidden, has_output):
    """Build the fused kernel for a fixed (static) layer count.

    Kernel ref layout:
      x, [w (Din,Dout), gb (2,Dout)] * num_hidden, [w_out_row (1,cur), b_out (1,1)]?, o_ref
    """

    def kernel(*refs):
        idx = 0
        h = refs[idx][...]                       # (B, Din) float32
        idx += 1
        inv_n = 1.0 / h.shape[0]                 # static at trace time

        for _ in range(num_hidden):
            w = refs[idx][...]                   # (Din, Dout), f32 or bf16 (pre-cast)
            gb = refs[idx + 1][...]              # (2, Dout) f32: row0=gamma, row1=beta
            idx += 2
            gamma = gb[0:1, :]
            beta = gb[1:2, :]

            # Linear on the MXU (no bias: cancelled by BN mean subtraction).
            lhs = h if h.dtype == w.dtype else h.astype(w.dtype)
            y = jnp.dot(lhs, w, preferred_element_type=jnp.float32)   # (B, Dout) f32

            # Single-pass BN stats + affine folded to one scale/shift.
            s = jnp.sum(y, axis=0, keepdims=True)
            sq = jnp.sum(y * y, axis=0, keepdims=True)
            mean = s * inv_n
            var = jnp.maximum(sq * inv_n - mean * mean, 0.0)          # clamp: no NaN rsqrt
            scale = gamma * jax.lax.rsqrt(var + EPS)                  # (1, Dout)
            shift = beta - mean * scale                               # (1, Dout)

            # BN + ReLU (Dropout is identity in eval mode).
            h = jnp.maximum(y * scale + shift, 0.0)

        o_ref = refs[-1]
        if has_output:
            # Final Linear(cur, 1) emitted lane-dense:  out[0, b] = <w_out, h[b,:]> + b_out
            # (same contraction pattern as q @ k^T — contracts both last dims).
            w_out = refs[idx][...]               # (1, cur) lane-dense row
            b_out = refs[idx + 1][...]           # (1, 1)
            y = jax.lax.dot_general(
                w_out, h, (((1,), (1,)), ((), ())),
                preferred_element_type=jnp.float32) + b_out           # (1, B)
            o_ref[...] = y.astype(o_ref.dtype)
        else:
            o_ref[...] = h.astype(o_ref.dtype)

    return kernel


# ----------------------------------------------------------------------------- params prep
def prepare_params(params, *, matmul_dtype=None):
    """Convert PyTorch-shaped params into kernel-ready packed params (done once).

    * hidden Linear bias dropped (cancelled by training-mode BN)
    * gamma/beta packed into a single (2, Dout) slab per layer (fewer padded DMAs)
    * weights optionally pre-cast to `matmul_dtype` (e.g. bf16 on v6e/v7x) so the kernel
      never re-casts weight tiles and their VMEM/DMA footprint is halved
    """
    prep = {"hidden": [], "out": None}
    for (w, _b, gamma, beta) in params["hidden"]:
        w_k = w if matmul_dtype is None else w.astype(matmul_dtype)
        gb = jnp.concatenate([gamma, beta], axis=0)        # (2, Dout)
        prep["hidden"].append((w_k, gb))
    if params["out"] is not None:
        w_out, b_out = params["out"]                        # (cur, 1), (1, 1)
        prep["out"] = (w_out.reshape(1, -1), b_out)         # lane-dense (1, cur)
    return prep


# ----------------------------------------------------------------------------- wrapper
def mlp_pallas(x, prep):
    """Run the whole MLP as one fused pallas_call (all operands VMEM-resident)."""
    B = x.shape[0]
    num_hidden = len(prep["hidden"])
    has_output = prep["out"] is not None

    flat = [x]
    for (w, gb) in prep["hidden"]:
        flat += [w, gb]
    if has_output:
        w_out, b_out = prep["out"]
        flat += [w_out, b_out]
        out_shape = (1, B)                                  # lane-dense row
    else:
        out_dim = prep["hidden"][-1][0].shape[1] if num_hidden else x.shape[1]
        out_shape = (B, out_dim)

    kernel = _make_fused_mlp_kernel(num_hidden, has_output)
    vmem = pl.BlockSpec(memory_space=pltpu.MemorySpace.VMEM)   # whole array, VMEM-resident

    out = pl.pallas_call(
        kernel,
        out_shape=jax.ShapeDtypeStruct(out_shape, jnp.float32),
        in_specs=[vmem] * len(flat),
        out_specs=vmem,
    )(*flat)

    if has_output:
        out = out.reshape(B, 1)                             # layout plumbing only
    return out


@jax.jit
def mlp_forward(x, prep):
    return mlp_pallas(x, prep)


# ----------------------------------------------------------------------------- params init
def init_mlp_params(key, input_dim, embed_dims, output_layer=True):
    """Deterministic synthetic parameters matching the PyTorch module's shapes."""
    params = {"hidden": [], "out": None}
    cur = input_dim
    for dim in embed_dims:
        key, kw, kb = jax.random.split(key, 3)
        bound = 1.0 / jnp.sqrt(cur)
        w = jax.random.uniform(kw, (cur, dim), jnp.float32, -bound, bound)   # (in, out)
        b = jax.random.uniform(kb, (1, dim), jnp.float32, -bound, bound)
        gamma = jnp.ones((1, dim), jnp.float32)
        beta = jnp.zeros((1, dim), jnp.float32)
        params["hidden"].append((w, b, gamma, beta))
        cur = dim
    if output_layer:
        key, kw, kb = jax.random.split(key, 3)
        bound = 1.0 / jnp.sqrt(cur)
        w = jax.random.uniform(kw, (cur, 1), jnp.float32, -bound, bound)
        b = jax.random.uniform(kb, (1, 1), jnp.float32, -bound, bound)
        params["out"] = (w, b)
    return params


# ----------------------------------------------------------------------------- reference
def mlp_reference(x, params):
    """Pure-JAX reference of the PyTorch forward (WITH hidden bias, two-pass BN)."""
    h = x
    for (w, b, gamma, beta) in params["hidden"]:
        y = h @ w + b
        mean = jnp.mean(y, axis=0, keepdims=True)
        var = jnp.mean((y - mean) ** 2, axis=0, keepdims=True)
        y = (y - mean) / jnp.sqrt(var + EPS) * gamma + beta
        h = jnp.maximum(y, 0.0)
    if params["out"] is not None:
        w, b = params["out"]
        h = h @ w + b
    return h


# ----------------------------------------------------------------------------- main
if __name__ == "__main__":
    key = jax.random.PRNGKey(0)
    k_x, k_p = jax.random.split(key)

    batch = 8
    input_dim = 16
    embed_dims = [32, 16]
    dropout = 0.2  # identity in eval mode

    x = jax.random.normal(k_x, (batch, input_dim), dtype=jnp.float32)
    params = init_mlp_params(k_p, input_dim, embed_dims, output_layer=True)

    # f32 weights here; pass matmul_dtype=jnp.bfloat16 on v6e/v7x at scaled dims.
    prep = prepare_params(params, matmul_dtype=None)

    out = jax.block_until_ready(mlp_forward(x, prep))
    ref = mlp_reference(x, params)

    assert out.shape == (batch, 1), out.shape
    assert jnp.allclose(out, ref, atol=1e-4, rtol=1e-4), (out, ref)

    print("KERNEL_OK")
</pallas_src>

<mosaic_0001>
module attributes {stable_mosaic.version = 11 : i64} {
  func.func @kernel(%arg0: memref<8x16xf32, #tpu.memory_space<vmem>>, %arg1: memref<16x32xf32, #tpu.memory_space<vmem>>, %arg2: memref<2x32xf32, #tpu.memory_space<vmem>>, %arg3: memref<32x16xf32, #tpu.memory_space<vmem>>, %arg4: memref<2x16xf32, #tpu.memory_space<vmem>>, %arg5: memref<1x16xf32, #tpu.memory_space<vmem>>, %arg6: memref<1x1xf32, #tpu.memory_space<vmem>>, %arg7: memref<1x8xf32, #tpu.memory_space<vmem>>) attributes {dimension_semantics = [], scalar_prefetch = 0 : i64, scratch_operands = 0 : i64, tpu.core_type = #tpu.core_type<tc>} {
    %c0 = arith.constant 0 : index
    %c0_0 = arith.constant 0 : index
    %0 = vector.load %arg0[%c0, %c0_0] : memref<8x16xf32, #tpu.memory_space<vmem>>, vector<8x16xf32>
    %c0_1 = arith.constant 0 : index
    %c0_2 = arith.constant 0 : index
    %1 = vector.load %arg1[%c0_1, %c0_2] : memref<16x32xf32, #tpu.memory_space<vmem>>, vector<16x32xf32>
    %c0_3 = arith.constant 0 : index
    %c0_4 = arith.constant 0 : index
    %2 = vector.load %arg2[%c0_3, %c0_4] : memref<2x32xf32, #tpu.memory_space<vmem>>, vector<2x32xf32>
    %3 = vector.extract_strided_slice %2 {offsets = [0, 0], sizes = [1, 32], strides = [1, 1]} : vector<2x32xf32> to vector<1x32xf32>
    %4 = vector.extract_strided_slice %2 {offsets = [1, 0], sizes = [1, 32], strides = [1, 1]} : vector<2x32xf32> to vector<1x32xf32>
    %cst = arith.constant dense<0.000000e+00> : vector<8x32xf32>
    %5 = tpu.matmul %0, %1, %cst {dimension_numbers = #tpu.dot_dimension_numbers<[1], [0], [0], [1], [0, 0, 1, 1], [], []>} : vector<8x16xf32>, vector<16x32xf32>, vector<8x32xf32> -> vector<8x32xf32>
    %cst_5 = arith.constant dense<0.000000e+00> : vector<32xf32>
    %6 = vector.multi_reduction <add>, %5, %cst_5 [0] : vector<8x32xf32> to vector<32xf32>
    %7 = vector.shape_cast %6 : vector<32xf32> to vector<1x32xf32>
    %8 = arith.mulf %5, %5 : vector<8x32xf32>
    %cst_6 = arith.constant dense<0.000000e+00> : vector<32xf32>
    %9 = vector.multi_reduction <add>, %8, %cst_6 [0] : vector<8x32xf32> to vector<32xf32>
    %10 = vector.shape_cast %9 : vector<32xf32> to vector<1x32xf32>
    %cst_7 = arith.constant 1.250000e-01 : f32
    %11 = vector.broadcast %cst_7 : f32 to vector<1x32xf32>
    %12 = arith.mulf %7, %11 : vector<1x32xf32>
    %cst_8 = arith.constant 1.250000e-01 : f32
    %13 = vector.broadcast %cst_8 : f32 to vector<1x32xf32>
    %14 = arith.mulf %10, %13 : vector<1x32xf32>
    %15 = arith.mulf %12, %12 : vector<1x32xf32>
    %16 = arith.subf %14, %15 : vector<1x32xf32>
    %cst_9 = arith.constant 0.000000e+00 : f32
    %17 = vector.broadcast %cst_9 : f32 to vector<1x32xf32>
    %18 = arith.maximumf %16, %17 : vector<1x32xf32>
    %cst_10 = arith.constant 9.99999974E-6 : f32
    %19 = vector.broadcast %cst_10 : f32 to vector<1x32xf32>
    %20 = arith.addf %18, %19 : vector<1x32xf32>
    %21 = math.rsqrt %20 : vector<1x32xf32>
    %22 = arith.mulf %3, %21 : vector<1x32xf32>
    %23 = arith.mulf %12, %22 : vector<1x32xf32>
    %24 = arith.subf %4, %23 : vector<1x32xf32>
    %25 = vector.broadcast %22 : vector<1x32xf32> to vector<8x32xf32>
    %26 = arith.mulf %5, %25 : vector<8x32xf32>
    %27 = vector.broadcast %24 : vector<1x32xf32> to vector<8x32xf32>
    %28 = arith.addf %26, %27 : vector<8x32xf32>
    %cst_11 = arith.constant 0.000000e+00 : f32
    %29 = vector.broadcast %cst_11 : f32 to vector<8x32xf32>
    %30 = arith.maximumf %28, %29 : vector<8x32xf32>
    %c0_12 = arith.constant 0 : index
    %c0_13 = arith.constant 0 : index
    %31 = vector.load %arg3[%c0_12, %c0_13] : memref<32x16xf32, #tpu.memory_space<vmem>>, vector<32x16xf32>
    %c0_14 = arith.constant 0 : index
    %c0_15 = arith.constant 0 : index
    %32 = vector.load %arg4[%c0_14, %c0_15] : memref<2x16xf32, #tpu.memory_space<vmem>>, vector<2x16xf32>
    %33 = vector.extract_strided_slice %32 {offsets = [0, 0], sizes = [1, 16], strides = [1, 1]} : vector<2x16xf32> to vector<1x16xf32>
    %34 = vector.extract_strided_slice %32 {offsets = [1, 0], sizes = [1, 16], strides = [1, 1]} : vector<2x16xf32> to vector<1x16xf32>
    %cst_16 = arith.constant dense<0.000000e+00> : vector<8x16xf32>
    %35 = tpu.matmul %30, %31, %cst_16 {dimension_numbers = #tpu.dot_dimension_numbers<[1], [0], [0], [1], [0, 0, 1, 1], [], []>} : vector<8x32xf32>, vector<32x16xf32>, vector<8x16xf32> -> vector<8x16xf32>
    %cst_17 = arith.constant dense<0.000000e+00> : vector<16xf32>
    %36 = vector.multi_reduction <add>, %35, %cst_17 [0] : vector<8x16xf32> to vector<16xf32>
    %37 = vector.shape_cast %36 : vector<16xf32> to vector<1x16xf32>
    %38 = arith.mulf %35, %35 : vector<8x16xf32>
    %cst_18 = arith.constant dense<0.000000e+00> : vector<16xf32>
    %39 = vector.multi_reduction <add>, %38, %cst_18 [0] : vector<8x16xf32> to vector<16xf32>
    %40 = vector.shape_cast %39 : vector<16xf32> to vector<1x16xf32>
    %cst_19 = arith.constant 1.250000e-01 : f32
    %41 = vector.broadcast %cst_19 : f32 to vector<1x16xf32>
    %42 = arith.mulf %37, %41 : vector<1x16xf32>
    %cst_20 = arith.constant 1.250000e-01 : f32
    %43 = vector.broadcast %cst_20 : f32 to vector<1x16xf32>
    %44 = arith.mulf %40, %43 : vector<1x16xf32>
    %45 = arith.mulf %42, %42 : vector<1x16xf32>
    %46 = arith.subf %44, %45 : vector<1x16xf32>
    %cst_21 = arith.constant 0.000000e+00 : f32
    %47 = vector.broadcast %cst_21 : f32 to vector<1x16xf32>
    %48 = arith.maximumf %46, %47 : vector<1x16xf32>
    %cst_22 = arith.constant 9.99999974E-6 : f32
    %49 = vector.broadcast %cst_22 : f32 to vector<1x16xf32>
    %50 = arith.addf %48, %49 : vector<1x16xf32>
    %51 = math.rsqrt %50 : vector<1x16xf32>
    %52 = arith.mulf %33, %51 : vector<1x16xf32>
    %53 = arith.mulf %42, %52 : vector<1x16xf32>
    %54 = arith.subf %34, %53 : vector<1x16xf32>
    %55 = vector.broadcast %52 : vector<1x16xf32> to vector<8x16xf32>
    %56 = arith.mulf %35, %55 : vector<8x16xf32>
    %57 = vector.broadcast %54 : vector<1x16xf32> to vector<8x16xf32>
    %58 = arith.addf %56, %57 : vector<8x16xf32>
    %cst_23 = arith.constant 0.000000e+00 : f32
    %59 = vector.broadcast %cst_23 : f32 to vector<8x16xf32>
    %60 = arith.maximumf %58, %59 : vector<8x16xf32>
    %c0_24 = arith.constant 0 : index
    %c0_25 = arith.constant 0 : index
    %61 = vector.load %arg5[%c0_24, %c0_25] : memref<1x16xf32, #tpu.memory_space<vmem>>, vector<1x16xf32>
    %c0_26 = arith.constant 0 : index
    %c0_27 = arith.constant 0 : index
    %62 = vector.load %arg6[%c0_26, %c0_27] : memref<1x1xf32, #tpu.memory_space<vmem>>, vector<1x1xf32>
    %cst_28 = arith.constant dense<0.000000e+00> : vector<1x8xf32>
    %63 = tpu.matmul %61, %60, %cst_28 {dimension_numbers = #tpu.dot_dimension_numbers<[1], [1], [0], [0], [0, 0, 1, 0], [], []>} : vector<1x16xf32>, vector<8x16xf32>, vector<1x8xf32> -> vector<1x8xf32>
    %64 = vector.broadcast %62 : vector<1x1xf32> to vector<1x8xf32>
    %65 = arith.addf %63, %64 : vector<1x8xf32>
    %c0_29 = arith.constant 0 : index
    %c0_30 = arith.constant 0 : index
    %66 = vector.load %arg7[%c0_29, %c0_30] : memref<1x8xf32, #tpu.memory_space<vmem>>, vector<1x8xf32>
    tpu.vector_store %arg7[%c0_29, %c0_30], %65 {strides = array<i32>} : memref<1x8xf32, #tpu.memory_space<vmem>>, vector<1x8xf32>,
    return
  }
}

</mosaic_0001>

<bundles_post_ra>
// kernel: mlp_forward.1
= control target key start
LH: loop header
LB: loop body
LE: loop exit
PB: predicated region body
PF: predicated region fallthrough
CT: control target
= control target key end

     0   :  { %s545_s0 = inlined_call_operand.vmem [shape: f32[8,16], index: 0, kind: input, shape index: {}]   ;;  %s546_s1 = inlined_call_operand.vmem [shape: f32[16,32], index: 1, kind: input, shape index: {}]   ;;  %s547_s2 = inlined_call_operand.vmem [shape: f32[2,32], index: 2, kind: input, shape index: {}]   ;;  %s548_s3 = inlined_call_operand.vmem [shape: f32[32,16], index: 3, kind: input, shape index: {}]   ;;  %s549_s4 = inlined_call_operand.vmem [shape: f32[2,16], index: 4, kind: input, shape index: {}]   ;;  %s550_s5 = inlined_call_operand.vmem [shape: f32[1,16], index: 5, kind: input, shape index: {}]   ;;  %s551_s6 = inlined_call_operand.<no memory space> [shape: f32[1,1], index: 6, kind: input, shape index: {}]   ;;  %s552_s7 = inlined_call_operand.hbm [shape: f32[1,8], index: 7, kind: output, shape index: {}]  }
   0x1   :  { %v12_v0 = vstv %s551_s6 }
   0x2   :  { %13 = vst [vmem:[#allocation2] sm:$0x1] %v12_v0 }
   0x3   :  { %v30_v1 = vld [vmem:[%s546_s1] sm:$0xff]  ;;  %v31_v2 = vld [vmem:[%s546_s1 + $0x8] sm:$0xff]  ;;  %v447_v3 = vmov 0.0|0.0   ;;  %vm448_vm0 = vmmov 0   ;;  %v449_v5 = vmov 0.0  }
   0x4   :  { %404 = vmatprep.subr.bf16.mxu0 %v447_v3  ;;  %v405_v4 = vpack.c.bf16 %v31_v2, %v30_v1  ;;  %385 = vmatprep.mubr.msk.f32.mxu0 %vm448_vm0, %v449_v5 }
   0x5   :  { %14 = vsyncpa [#allocation4], 0  ;;  %407 = vmatprep.subr.bf16.mxu1 %v447_v3  ;;  %396 = vmatprep.mubr.msk.f32.mxu1 %vm448_vm0, %v449_v5  ;;  %v29_v6 = vld [vmem:[%s545_s0] sm:$0xff]  ;;  %vm33_vm1 = vcmask 130048   ;;  %v148_v8 = vld [vmem:[%s548_s3 + $0x8] sm:$0xff]  ;;  %vm107_vm2 = vcmask 261120   ;;  %v136_v36 = vlaneseq }
   0x6   :  { %406 = vmatpush3.bf16.msra.mxu0 %v405_v4  ;;  %v147_v7 = vld [vmem:[%s548_s3] sm:$0xff]  ;;  %v149_v10 = vld [vmem:[%s548_s3 + $0x10] sm:$0xff]  ;;  %v150_v11 = vld [vmem:[%s548_s3 + $0x18] sm:$0xff]  ;;  %v450_v52 = vmov 0   ;;  %vm351_vm3 = vcmask 57344  }
   0x7   :  { %399 = vmatprep.subr.mxu0 %v449_v5  ;;  %v408_v9 = vpack.c.bf16 %v148_v8, %v147_v7  ;;  %v411_v12 = vpack.c.bf16 %v150_v11, %v149_v10  ;;  %v137_v37 = vshrl.u32 %v136_v36, 7  ;;  %v32_v38 = vld [vmem:[%s547_s2] sm:$0x3]  ;;  %418 = vset.pattern.permute.xlu0 %v450_v52 }
   0x9   :  { %386 = vmatmul.mubr.msk.f32.vlgmr.msra.gmra.mrb[0].mxu0 %vm33_vm1, %v29_v6  ;;  %409 = vmatpush3.bf16.msra.mxu1 %v408_v9  ;;  %v138_v41 = vsub.s32 0, %v137_v37  ;;  %v143_v45 = vsub.s32 1, %v137_v37  ;;  %v265_v51 = vld [vmem:[#allocation2] sm:$0x1] }
   0xa   :  { %401 = vmatprep.mubr.msk.f32.mxu0 %vm448_vm0, %v449_v5  ;;  %410 = vmatprep.subr.bf16.mxu1 %v447_v3 }
   0xb   :  { %268 = vperm.xlu0 %418, %v265_v51  }
   0xd   :  { %412 = vmatpush3.bf16.msra.mxu1 %v411_v12  ;;  %v151_v12 = vld [vmem:[%s549_s4] sm:$0x3]  ;;  %s451_s4 = smov [#allocation3]  }
   0xe   :  { %s359_s18 = sshll.u32 %s451_s4, 4  ;;  %s360_s18 = int_to_ptr.vmem [resolvable:$true] %s359_s18 }
   0xf   :  { %s423_s19 = scalar_lea.vmem %s360_s18, 16  ;;  %s427_s20 = scalar_lea.vmem %s360_s18, 32 }
  0x10   :  { %p424_p0 = scmp.ne.s32.totalorder %s360_s18, %s423_s19  ;;  %p428_p1 = scmp.lt.s32.totalorder %s360_s18, %s360_s18 }
  0x11   :  { %p429_p2 = scmp.lt.s32.totalorder %s427_s20, %s423_s19 }
  0x13   :  { %p430_p3 = por %p429_p2, %p428_p1 }
  0x15   :  { %p431_p4 = pnand %p430_p3, %p424_p0 }
  0xdc   :  { %v103_v13 = vpop.f32.mrb[0].mxu0 }
  0xdd   :  { %v108_v14 = vsel %vm107_vm2, %v103_v13, 0.0  ;;  %v115_v15 = vmul.f32 %v103_v13, %v103_v13  ;;  %v387_v16 = vpop.f32.mrb[1].mxu0 }
  0xde   :  { %v109_v17 = vrot.slane %v108_v14, 4 }
  0xdf   :  { %v116_v18 = vsel %vm107_vm2, %v115_v15, 0.0 }
  0xe0   :  { %v110_v19 = vadd.f32 %v109_v17, %v108_v14  ;;  %v117_v20 = vrot.slane %v116_v18, 4 }
  0xe2   :  { %v111_v21 = vrot.slane %v110_v19, 2  ;;  %v118_v22 = vadd.f32 %v117_v20, %v116_v18 }
  0xe4   :  { %v112_v23 = vadd.f32 %v111_v21, %v110_v19  ;;  %v119_v24 = vrot.slane %v118_v22, 2 }
  0xe6   :  { %v113_v25 = vrot.slane %v112_v23, 1  ;;  %v120_v26 = vadd.f32 %v119_v24, %v118_v22  ;;  %v269_v24 = vpop.permute.xlu0 %268 }
  0xe8   :  { %v114_v27 = vadd.f32 %v113_v25, %v112_v23  ;;  %v121_v28 = vrot.slane %v120_v26, 1  ;;  %v264_v23 = vld [vmem:[%s550_s5] sm:$0x1]  ;;  %v274_v25 = vrot.slane %v269_v24, %v138_v41 }
  0xea   :  { %v122_v29 = vadd.f32 %v121_v28, %v120_v26  ;;  %v123_v30 = vmul.f32 0.125, %v114_v27 }
  0xec   :  { %v124_v31 = vmul.f32 0.125, %v122_v29  ;;  %v125_v32 = vmul.f32 %v123_v30, %v123_v30 }
  0xee   :  { %v126_v33 = vsub.f32 %v124_v31, %v125_v32 }
  0xf0   :  { %v127_v34 = vmax.f32 %v126_v33, 0.0 }
  0xf2   :  { %v128_v35 = vadd.f32 1e-05, %v127_v34 }
  0xf4   :  { %419 = vrsqrt.f32 %v128_v35 }
  0xfe   :  { %v420_v39 = vpop.eup %419 }
  0xff   :  { %v130_v40 = vmul.f32 %v420_v39, %v32_v38 }
 0x101   :  { %v131_v42 = vmul.f32 %v130_v40, %v123_v30  ;;  %v139_v44 = vrot.slane %v130_v40, %v138_v41 }
 0x103   :  { %v133_v43 = vrot.slane %v131_v42, 7  ;;  %v140_v47 = vmul.f32 %v139_v44, %v103_v13 }
 0x105   :  { %v135_v46 = vsub.f32 %v32_v38, %v133_v43 }
 0x107   :  { %v144_v48 = vrot.slane %v135_v46, %v143_v45 }
 0x109   :  { %v145_v49 = vadd.f32 %v144_v48, %v140_v47 }
 0x10b   :  { %v146_v50 = vmax.f32 %v145_v49, 0.0 }
 0x10d   :  { %397 = vmatmul.mubr.msk.f32.vlgmr.msra.gmra.mrb[0].mxu1 %vm107_vm2, %v146_v50 }
 0x1e0   :  { %v221_v53 = vpop.f32.mrb[0].mxu1 }
 0x1e1   :  { %v225_v54 = vsel %vm33_vm1, %v221_v53, 0.0  ;;  %v232_v55 = vmul.f32 %v221_v53, %v221_v53  ;;  %v398_v56 = vpop.f32.mrb[1].mxu1 }
 0x1e2   :  { %v226_v57 = vrot.slane %v225_v54, 4 }
 0x1e3   :  { %v233_v58 = vsel %vm33_vm1, %v232_v55, 0.0 }
 0x1e4   :  { %v227_v59 = vadd.f32 %v226_v57, %v225_v54  ;;  %v234_v60 = vrot.slane %v233_v58, 4 }
 0x1e6   :  { %v228_v61 = vrot.slane %v227_v59, 2  ;;  %v235_v62 = vadd.f32 %v234_v60, %v233_v58 }
 0x1e8   :  { %v229_v63 = vadd.f32 %v228_v61, %v227_v59  ;;  %v236_v0 = vrot.slane %v235_v62, 2 }
 0x1ea   :  { %v230_v1 = vrot.slane %v229_v63, 1  ;;  %v237_v2 = vadd.f32 %v236_v0, %v235_v62 }
 0x1ec   :  { %v231_v3 = vadd.f32 %v230_v1, %v229_v63  ;;  %v238_v4 = vrot.slane %v237_v2, 1 }
 0x1ee   :  { %v239_v5 = vadd.f32 %v238_v4, %v237_v2  ;;  %v240_v6 = vmul.f32 0.125, %v231_v3 }
 0x1f0   :  { %v241_v7 = vmul.f32 0.125, %v239_v5  ;;  %v242_v8 = vmul.f32 %v240_v6, %v240_v6 }
 0x1f2   :  { %v243_v9 = vsub.f32 %v241_v7, %v242_v8 }
 0x1f4   :  { %v244_v10 = vmax.f32 %v243_v9, 0.0 }
 0x1f6   :  { %v245_v11 = vadd.f32 1e-05, %v244_v10 }
 0x1f8   :  { %421 = vrsqrt.f32 %v245_v11 }
 0x202   :  { %v422_v13 = vpop.eup %421 }
 0x203   :  { %v247_v14 = vmul.f32 %v422_v13, %v151_v12 }
 0x205   :  { %v248_v15 = vmul.f32 %v247_v14, %v240_v6  ;;  %v256_v17 = vrot.slane %v247_v14, %v138_v41 }
 0x207   :  { %v250_v16 = vrot.slane %v248_v15, 7  ;;  %v257_v19 = vmul.f32 %v256_v17, %v221_v53 }
 0x209   :  { %v252_v18 = vsub.f32 %v151_v12, %v250_v16 }
 0x20b   :  { %v261_v20 = vrot.slane %v252_v18, %v143_v45 }
 0x20d   :  { %v262_v21 = vadd.f32 %v261_v20, %v257_v19 }
 0x20f   :  { %v263_v22 = vmax.f32 %v262_v21, 0.0 }
 0x211   :  { %400 = vmatpush3.xpose.msk.msra.mxu0 %vm33_vm1, %v263_v22 }
 0x214   :  { %402 = vmatmul.mubr.msk.f32.vlgmr.msra.gmra.mrb[2].mxu0 %vm33_vm1, %v264_v23 }
 0x2e7   :  { %v347_v26 = vpop.f32.mrb[2].mxu0 }
 0x2e8   :  { %v348_v27 = vadd.f32 %v347_v26, %v274_v25  ;;  %v403_v28 = vpop.f32.mrb[3].mxu0 }
 0x2ea   :  { %352 = vst.msk [vmem:[#allocation3] sm:$0x1] %vm351_vm3, %v348_v27 }
 0x2eb   :  { %434 = shalt.err (!%p431_p4)
}
 0x2ec   :  { %s435_s22 = scalar_lea.hbm %s552_s7, 16 }
 0x2ed   :  { %p436_p5 = scmp.ne.s32.totalorder %s552_s7, %s435_s22  ;;  %p439_p6 = scmp.lt.u32.totalorder %s435_s22, %s552_s7 }
 0x2ef   :  { %p441_p7 = pnand %p439_p6, %p436_p5 }
 0x2f1   :  { %444 = shalt.err (!%p441_p7)
}
 0x2f2   :  { %362 = dma.vmem_to_hbm [thread:$0]  %s360_s18, 16, %s552_s7, [#allocation4]  }
 0x2f3   :  { %445 = dma.done.wait [#allocation4], 16  }
 0x2f4   :  { %446 = vsyncadd [#allocation4], 4294967280 }
 0x2f5   :  { %366 = vsyncpa [#allocation4], 1 }

</bundles_post_ra>
